<compile_context>
chip_gen: v5e
topology: v5e:2x2
jax: 0.10.0
libtpu: 0.0.40
codegen_flags: <defaults>
</compile_context>

<pallas_src>
import math
from functools import partial

import jax
import jax.numpy as jnp
from jax.experimental import pallas as pl
from jax.experimental.pallas import tpu as pltpu

BN_EPS = 1e-5
VMEM_LIMIT = 32 * 1024 * 1024  # safe scoped-VMEM request on v5e / v6e / v7x


def _round_up(x, m):
    return (x + m - 1) // m * m


def _pick_tiles(M, K, N):
    # TM sized to the real (8-aligned) row count -- avoids 16x padding waste
    # when M is small (deep-layer / small-batch cases).
    TM = min(128, _round_up(M, 8))
    # 256-wide output tiles only when the N grid stays >= 2 (keeps both v7x
    # TensorCores busy via the 'parallel' j axis); 128 is MXU-native on v5e.
    TN = 256 if N > 256 else 128
    # Larger K tiles cut grid-step overhead; 512 stays well inside scoped VMEM.
    TK = min(512, _round_up(K, 128))
    return TM, TN, TK


# ----------------------------------------------------------------------------
# Pallas kernels
# ----------------------------------------------------------------------------
def _mm_bias_kernel(x_ref, w_ref, b_ref, o_ref, acc_ref, *, relu):
    """out = maybe_relu(x @ w + bias); accumulate over the k grid axis."""
    k = pl.program_id(2)

    @pl.when(k == 0)
    def _():
        acc_ref[...] = jnp.zeros_like(acc_ref)

    acc_ref[...] += jnp.dot(x_ref[...], w_ref[...],
                            preferred_element_type=jnp.float32)

    @pl.when(k == pl.num_programs(2) - 1)
    def _():
        y = acc_ref[...] + b_ref[...]
        if relu:
            y = jnp.maximum(y, 0.0)
        o_ref[...] = y.astype(o_ref.dtype)


def _mm_bias_res_kernel(x_ref, w_ref, b_ref, r_ref, o_ref, acc_ref, *, relu):
    """out = maybe_relu(x @ w + bias) + residual.

    The residual is added AFTER the ReLU, matching
    `out = self.layer(x); return out + shortcut` in the PyTorch module
    (the last conv helper already ends with ReLU, no ReLU after the add)."""
    k = pl.program_id(2)

    @pl.when(k == 0)
    def _():
        acc_ref[...] = jnp.zeros_like(acc_ref)

    acc_ref[...] += jnp.dot(x_ref[...], w_ref[...],
                            preferred_element_type=jnp.float32)

    @pl.when(k == pl.num_programs(2) - 1)
    def _():
        y = acc_ref[...] + b_ref[...]
        if relu:
            y = jnp.maximum(y, 0.0)
        y = y + r_ref[...]
        o_ref[...] = y.astype(o_ref.dtype)


def _conv3x3_kernel(x_ref, w_ref, b_ref, o_ref, acc_ref, *, relu):
    """Fused 3x3 conv (stride 1, pad 1) + bias + ReLU.

    Grid = (N, H_out, 3): the 3 row taps are the (arbitrary) reduction axis;
    the 3 column taps are unrolled sublane slices of one padded input row.
    im2col is never materialized in HBM."""
    di = pl.program_id(2)

    @pl.when(di == 0)
    def _():
        acc_ref[...] = jnp.zeros_like(acc_ref)

    x_row = x_ref[0, 0, :, :]           # (W+2, Cin)   bf16, one padded row
    w_row = w_ref[0, :, :]              # (3*Cin, Cout) bf16, this row tap
    wo, _ = acc_ref.shape
    cin = x_row.shape[-1]

    acc = acc_ref[...]
    for dj in range(3):                 # unrolled column taps
        acc = acc + jnp.dot(x_row[dj:dj + wo, :],
                            w_row[dj * cin:(dj + 1) * cin, :],
                            preferred_element_type=jnp.float32)
    acc_ref[...] = acc

    @pl.when(di == pl.num_programs(2) - 1)
    def _():
        y = acc_ref[...] + b_ref[...]
        if relu:
            y = jnp.maximum(y, 0.0)
        o_ref[0, 0, :, :] = y.astype(o_ref.dtype)


# ----------------------------------------------------------------------------
# Fused matmul + bias (+ReLU) (+residual) wrapper  --  used for the 1x1 convs
# ----------------------------------------------------------------------------
def fused_matmul_bias(x, w, bias, *, relu, residual=None):
    M, K = x.shape
    K2, N = w.shape
    assert K == K2
    TM, TN, TK = _pick_tiles(M, K, N)
    Mp, Kp, Np = _round_up(M, TM), _round_up(K, TK), _round_up(N, TN)

    xp = jnp.pad(x.astype(jnp.bfloat16), ((0, Mp - M), (0, Kp - K)))
    wp = jnp.pad(w.astype(jnp.bfloat16), ((0, Kp - K), (0, Np - N)))
    bp = jnp.pad(bias.reshape(1, N).astype(jnp.float32),
                 ((0, 0), (0, Np - N)))

    in_specs = [
        pl.BlockSpec((TM, TK), lambda i, j, k: (i, k)),
        pl.BlockSpec((TK, TN), lambda i, j, k: (k, j)),
        pl.BlockSpec((1, TN), lambda i, j, k: (0, j)),
    ]
    args = [xp, wp, bp]
    if residual is None:
        kernel = partial(_mm_bias_kernel, relu=relu)
    else:
        rp = jnp.pad(residual.astype(jnp.float32),
                     ((0, Mp - M), (0, Np - N)))
        in_specs.append(pl.BlockSpec((TM, TN), lambda i, j, k: (i, j)))
        args.append(rp)
        kernel = partial(_mm_bias_res_kernel, relu=relu)

    grid = (Mp // TM, Np // TN, Kp // TK)
    out = pl.pallas_call(
        kernel,
        out_shape=jax.ShapeDtypeStruct((Mp, Np), jnp.float32),
        grid_spec=pltpu.PrefetchScalarGridSpec(
            num_scalar_prefetch=0,
            grid=grid,
            in_specs=in_specs,
            out_specs=pl.BlockSpec((TM, TN), lambda i, j, k: (i, j)),
            scratch_shapes=[pltpu.VMEM((TM, TN), jnp.float32)],
        ),
        compiler_params=pltpu.CompilerParams(
            dimension_semantics=("parallel", "parallel", "arbitrary"),
            vmem_limit_bytes=VMEM_LIMIT),
    )(*args)
    return out[:M, :N]


# ----------------------------------------------------------------------------
# Conv layers (Conv2d -> folded BatchNorm -> ReLU)
# ----------------------------------------------------------------------------
def conv1x1_bn_relu(x, w_mat, bias, *, stride=1, relu=True, residual=None):
    """1x1 conv (pad 0) + folded BN + ReLU, optionally + residual (after ReLU)."""
    xs = x[:, ::stride, ::stride, :] if stride > 1 else x
    n, ho, wo, c = xs.shape
    cout = w_mat.shape[1]
    lhs = xs.reshape(n * ho * wo, c)
    res = None if residual is None else residual.reshape(n * ho * wo, cout)
    y = fused_matmul_bias(lhs, w_mat, bias, relu=relu, residual=res)
    return y.reshape(n, ho, wo, cout)


def conv3x3_bn_relu(x, w_taps, bias, *, relu=True):
    """3x3 conv (stride 1, pad 1) + folded BN + ReLU, im2col fused in-kernel."""
    n, h, w, c = x.shape
    cout = w_taps.shape[-1]
    xp = jnp.pad(x.astype(jnp.bfloat16), ((0, 0), (1, 1), (1, 1), (0, 0)))
    wpad = w + 2

    return pl.pallas_call(
        partial(_conv3x3_kernel, relu=relu),
        out_shape=jax.ShapeDtypeStruct((n, h, w, cout), jnp.float32),
        grid_spec=pltpu.PrefetchScalarGridSpec(
            num_scalar_prefetch=0,
            grid=(n, h, 3),
            in_specs=[
                pl.BlockSpec((1, 1, wpad, c),
                             lambda ni, hi, di: (ni, hi + di, 0, 0)),
                pl.BlockSpec((1, 3 * c, cout),
                             lambda ni, hi, di: (di, 0, 0)),
                pl.BlockSpec((1, cout), lambda ni, hi, di: (0, 0)),
            ],
            out_specs=pl.BlockSpec((1, 1, w, cout),
                                   lambda ni, hi, di: (ni, hi, 0, 0)),
            scratch_shapes=[pltpu.VMEM((w, cout), jnp.float32)],
        ),
        compiler_params=pltpu.CompilerParams(
            dimension_semantics=("parallel", "parallel", "arbitrary"),
            vmem_limit_bytes=VMEM_LIMIT),
    )(xp, w_taps, bias.reshape(1, cout))


# ----------------------------------------------------------------------------
# Parameter init + weight pre-packing (BN folded, bf16 matmul matrices)
# ----------------------------------------------------------------------------
def _conv_init(key, cout, cin, k):
    # PyTorch Conv2d default init: U(-1/sqrt(fan_in), 1/sqrt(fan_in))
    fan_in = cin * k * k
    bound = 1.0 / math.sqrt(fan_in)
    kw, kb = jax.random.split(key)
    w = jax.random.uniform(kw, (cout, cin, k, k), jnp.float32, -bound, bound)
    b = jax.random.uniform(kb, (cout,), jnp.float32, -bound, bound)
    return w, b


def _fold_bn(w, b, gamma, beta, mean, var):
    # BatchNorm (eval mode) folded into the conv weight / bias.
    # TODO(synk): training-mode BatchNorm (per-batch statistics) has no clean
    # Pallas equivalent here; eval-mode running stats are folded in instead.
    scale = gamma / jnp.sqrt(var + BN_EPS)
    return w * scale[:, None, None, None], (b - mean) * scale + beta


def _default_bn(cout):
    return (jnp.ones((cout,), jnp.float32), jnp.zeros((cout,), jnp.float32),
            jnp.zeros((cout,), jnp.float32), jnp.ones((cout,), jnp.float32))


def _pack_conv1x1(key, cin, cout):
    w, b = _conv_init(key, cout, cin, 1)
    wf, bf = _fold_bn(w, b, *_default_bn(cout))
    w_mat = wf[:, :, 0, 0].T.astype(jnp.bfloat16)          # (Cin, Cout)
    return w_mat, bf.astype(jnp.float32)


def _pack_conv3x3(key, cin, cout):
    w, b = _conv_init(key, cout, cin, 3)
    wf, bf = _fold_bn(w, b, *_default_bn(cout))
    # (O, C, 3, 3) -> (3, 3, C, O) -> (3 row taps, 3*C, O)
    w_taps = jnp.transpose(wf, (2, 3, 1, 0)).reshape(3, 3 * cin, cout)
    return w_taps.astype(jnp.bfloat16), bf.astype(jnp.float32)


def make_residual_block(key, in_channels, middle_channels, out_channels,
                        downsample=False):
    k1, k2, k3, k4 = jax.random.split(key, 4)
    return {
        "downsample": downsample,
        "c1": _pack_conv1x1(k1, in_channels, middle_channels),
        "c2": _pack_conv3x3(k2, middle_channels, middle_channels),
        "c3": _pack_conv1x1(k3, middle_channels, out_channels),
        # downsize (downsample=True) / make_equal_channel: always applied,
        # because `x.size() is not out.size()` is always True in the module.
        "sc": _pack_conv1x1(k4, in_channels, out_channels),
    }


def residual_block_forward(params, x):
    """x: NHWC float32 -> NHWC float32."""
    s = 2 if params["downsample"] else 1
    # Shortcut projection: conv1x1 + BN + ReLU (the helper includes ReLU).
    shortcut = conv1x1_bn_relu(x, *params["sc"], stride=s, relu=True)
    h = conv1x1_bn_relu(x, *params["c1"], stride=s, relu=True)
    h = conv3x3_bn_relu(h, *params["c2"], relu=True)
    # Final conv ends with ReLU, then the shortcut is added (no ReLU after).
    out = conv1x1_bn_relu(h, *params["c3"], stride=1, relu=True,
                          residual=shortcut)
    return out


# ----------------------------------------------------------------------------
if __name__ == "__main__":
    key = jax.random.PRNGKey(0)
    kx, kb1, kb2 = jax.random.split(key, 3)

    # NCHW input, like the PyTorch module.
    x_nchw = jax.random.normal(kx, (2, 4, 16, 16), jnp.float32)

    # One non-downsample block and one downsample block to exercise both paths.
    blk1 = make_residual_block(kb1, 4, 8, 16, downsample=False)
    blk2 = make_residual_block(kb2, 16, 8, 32, downsample=True)

    x = jnp.transpose(x_nchw, (0, 2, 3, 1))       # NCHW -> NHWC
    y = residual_block_forward(blk1, x)           # (2, 16, 16, 16)
    y = residual_block_forward(blk2, y)           # (2, 8, 8, 32)
    y = jnp.transpose(y, (0, 3, 1, 2))            # NHWC -> NCHW

    y = jax.block_until_ready(y)
    assert y.shape == (2, 32, 8, 8) and y.dtype == jnp.float32
    assert bool(jnp.all(jnp.isfinite(y)))
    print("KERNEL_OK")
</pallas_src>

<mosaic_0001>
module attributes {stable_mosaic.version = 11 : i64} {
  func.func @_mm_bias_kernel(%arg0: i32, %arg1: i32, %arg2: i32, %arg3: memref<128x128xbf16, #tpu.memory_space<vmem>>, %arg4: memref<128x128xbf16, #tpu.memory_space<vmem>>, %arg5: memref<1x128xf32, #tpu.memory_space<vmem>>, %arg6: memref<128x128xf32, #tpu.memory_space<vmem>>, %arg7: memref<128x128xf32, #tpu.memory_space<vmem>>) attributes {dimension_semantics = [#tpu.dimension_semantics<parallel>, #tpu.dimension_semantics<parallel>, #tpu.dimension_semantics<arbitrary>], iteration_bounds = array<i64: 4, 1, 1>, scalar_prefetch = 0 : i64, scratch_operands = 1 : i64, tpu.core_type = #tpu.core_type<tc>, window_params = [{transform_indices = @transform_0, window_bounds = array<i64: 128, 128>}, {transform_indices = @transform_1, window_bounds = array<i64: 128, 128>}, {transform_indices = @transform_2, window_bounds = array<i64: 1, 128>}, {transform_indices = @transform_3, window_bounds = array<i64: 128, 128>}]} {
    %c0_i32 = arith.constant 0 : i32
    %0 = arith.cmpi eq, %arg2, %c0_i32 : i32
    %1 = arith.extui %0 : i1 to i32
    %c0_i32_0 = arith.constant 0 : i32
    %2 = arith.cmpi ne, %1, %c0_i32_0 : i32
    scf.if %2 {
      %cst_10 = arith.constant 0.000000e+00 : f32
      %12 = vector.broadcast %cst_10 : f32 to vector<128x128xf32>
      %c0_11 = arith.constant 0 : index
      %c0_12 = arith.constant 0 : index
      %13 = vector.load %arg7[%c0_11, %c0_12] : memref<128x128xf32, #tpu.memory_space<vmem>>, vector<128x128xf32>
      tpu.vector_store %arg7[%c0_11, %c0_12], %12 {strides = array<i32>} : memref<128x128xf32, #tpu.memory_space<vmem>>, vector<128x128xf32>,
    } else {
    }
    %c0 = arith.constant 0 : index
    %c0_1 = arith.constant 0 : index
    %3 = vector.load %arg7[%c0, %c0_1] : memref<128x128xf32, #tpu.memory_space<vmem>>, vector<128x128xf32>
    %c0_2 = arith.constant 0 : index
    %c0_3 = arith.constant 0 : index
    %4 = vector.load %arg3[%c0_2, %c0_3] : memref<128x128xbf16, #tpu.memory_space<vmem>>, vector<128x128xbf16>
    %c0_4 = arith.constant 0 : index
    %c0_5 = arith.constant 0 : index
    %5 = vector.load %arg4[%c0_4, %c0_5] : memref<128x128xbf16, #tpu.memory_space<vmem>>, vector<128x128xbf16>
    %cst = arith.constant dense<0.000000e+00> : vector<128x128xf32>
    %6 = tpu.matmul %4, %5, %cst {dimension_numbers = #tpu.dot_dimension_numbers<[1], [0], [0], [1], [0, 0, 1, 1], [], []>} : vector<128x128xbf16>, vector<128x128xbf16>, vector<128x128xf32> -> vector<128x128xf32>
    %7 = arith.addf %3, %6 : vector<128x128xf32>
    %c0_6 = arith.constant 0 : index
    %c0_7 = arith.constant 0 : index
    %8 = vector.load %arg7[%c0_6, %c0_7] : memref<128x128xf32, #tpu.memory_space<vmem>>, vector<128x128xf32>
    tpu.vector_store %arg7[%c0_6, %c0_7], %7 {strides = array<i32>} : memref<128x128xf32, #tpu.memory_space<vmem>>, vector<128x128xf32>,
    %c0_i32_8 = arith.constant 0 : i32
    %9 = arith.cmpi eq, %arg2, %c0_i32_8 : i32
    %10 = arith.extui %9 : i1 to i32
    %c0_i32_9 = arith.constant 0 : i32
    %11 = arith.cmpi ne, %10, %c0_i32_9 : i32
    scf.if %11 {
      %c0_10 = arith.constant 0 : index
      %c0_11 = arith.constant 0 : index
      %12 = vector.load %arg7[%c0_10, %c0_11] : memref<128x128xf32, #tpu.memory_space<vmem>>, vector<128x128xf32>
      %c0_12 = arith.constant 0 : index
      %c0_13 = arith.constant 0 : index
      %13 = vector.load %arg5[%c0_12, %c0_13] : memref<1x128xf32, #tpu.memory_space<vmem>>, vector<1x128xf32>
      %14 = vector.broadcast %13 : vector<1x128xf32> to vector<128x128xf32>
      %15 = arith.addf %12, %14 : vector<128x128xf32>
      %cst_14 = arith.constant 0.000000e+00 : f32
      %16 = vector.broadcast %cst_14 : f32 to vector<128x128xf32>
      %17 = arith.maximumf %15, %16 : vector<128x128xf32>
      %c0_15 = arith.constant 0 : index
      %c0_16 = arith.constant 0 : index
      %18 = vector.load %arg6[%c0_15, %c0_16] : memref<128x128xf32, #tpu.memory_space<vmem>>, vector<128x128xf32>
      tpu.vector_store %arg6[%c0_15, %c0_16], %17 {strides = array<i32>} : memref<128x128xf32, #tpu.memory_space<vmem>>, vector<128x128xf32>,
    } else {
    }
    return
  }
  func.func @transform_0(%arg0: i32, %arg1: i32, %arg2: i32) -> (i32, i32) {
    %c0_i32 = arith.constant 0 : i32
    return %arg0, %arg2 : i32, i32
  }
  func.func @transform_1(%arg0: i32, %arg1: i32, %arg2: i32) -> (i32, i32) {
    %c0_i32 = arith.constant 0 : i32
    return %arg2, %arg1 : i32, i32
  }
  func.func @transform_2(%arg0: i32, %arg1: i32, %arg2: i32) -> (i32, i32) {
    %c0_i32 = arith.constant 0 : i32
    %c0_i32_0 = arith.constant 0 : i32
    return %c0_i32, %arg1 : i32, i32
  }
  func.func @transform_3(%arg0: i32, %arg1: i32, %arg2: i32) -> (i32, i32) {
    %c0_i32 = arith.constant 0 : i32
    return %arg0, %arg1 : i32, i32
  }
}

</mosaic_0001>

<bundles_post_ra>
// kernel: tpu_custom_call.1
= control target key start
LH: loop header
LB: loop body
LE: loop exit
PB: predicated region body
PF: predicated region fallthrough
CT: control target
= control target key end

     0   :  { %s1286_s0 = inlined_call_operand.hbm [shape: bf16[512,128], index: 0, kind: input, shape index: {}]   ;;  %s1287_s1 = inlined_call_operand.hbm [shape: bf16[128,128], index: 1, kind: input, shape index: {}]   ;;  %s1288_s2 = inlined_call_operand.vmem [shape: f32[1,128], index: 2, kind: input, shape index: {}]   ;;  %s1289_s3 = inlined_call_operand.hbm [shape: f32[512,128], index: 3, kind: output, shape index: {}]  }
   0x1   :  { %1291 = sst [smem:[#allocation12_spill]] %s1287_s1 }
   0x2   :  { %8 = vsyncpa [#allocation4], 0 }
   0x3   :  { %10 = vsyncpa [#allocation4 + $0x1], 0 }
   0x4   :  { %11 = vsyncpa [#allocation7], 0 }
   0x5   :  { %12 = vsyncpa [#allocation5], 0 }
   0x6   :  { %14 = vsyncpa [#allocation5 + $0x1], 0  ;;  %s1082_s12 = smov 0   ;;  %s1084_s13 = smov 0  }
   0x7   :  { %s1086_s14 = smov 0   ;;  %s1088_s15 = smov 0  }
   0x8   :  { %s1090_s16 = smov 0   ;;  %s1092_s17 = smov 0  }
   0x9 LB: > { %s707_s18 = sadd.s32 4294967295, %s1055_s17   ;;  %s708_s19 = sadd.s32 4294967294, %s1055_s17   ;;  %s1055_s17 = sphi %s1092_s17, %s20_s17   ;;  %s1051_s16 = sphi %s1090_s16, %s1305_s16   ;;  %s1047_s15 = sphi %s1088_s15, %s1304_s15   ;;  %s1043_s14 = sphi %s1086_s14, %s1303_s14   ;;  %s1039_s13 = sphi %s1084_s13, %s1302_s13   ;;  %s1035_s12 = sphi %s1082_s12, %s1301_s12  }
   0xa   : > { %p61_p0 = scmp.ne.s32.totalorder %s1039_s13, %s1035_s12  ;;  %p1116_p1 = scmp.eq.s32.totalorder %s707_s18, 0 }
   0xb   : > { %p1120_p2 = scmp.eq.s32.totalorder %s707_s18, 3  ;;  %p147_p3 = scmp.eq.s32.totalorder %s708_s19, 3 }
   0xc   : > { %p1126_p4 = por %p1116_p1, %p61_p0  ;;  %p709_p5 = scmp.ge.s32.totalorder %s1055_s17, 1 }
   0xd   : > { %p1131_p6 = por %p147_p3, %p61_p0  ;;  %p154_p7 = scmp.lt.s32.totalorder %s1055_s17, 5 }
   0xe   : > { %s1296_s1 = sld [smem:[#allocation12_spill]]  ;;  %s1057_s28 = smov [#allocation6]  }
   0xf   : > { %p1139_p8 = pnand %p709_p5, %p154_p7  ;;  %s171_s29 = sshll.u32 %s1057_s28, 4  ;;  %s172_s29 = int_to_ptr.vmem [resolvable:$true] %s171_s29 }
  0x10   : > { %s1290_s30 = smov 64   ;;  %s1059_s4 = smov 4  }
  0x11   : > { %p839_p9 = pneg %p1139_p8  ;;  %s39_s5 = sadd.s32 1, %s1051_s16 }
  0x12   : > { %p41_p11 = scmp.ge.s32.totalorder %s39_s5, 4  ;;  %s48_s6 = sadd.s32 1, %s1043_s14 }
  0x13   : > { %p840_p10 = pnand %p839_p9, %p1116_p1  ;;  %p55_p12 = scmp.ne.s32.totalorder %s1043_s14, %s1039_s13 }
  0x14   : > { %s169_s26 = sshll.u32 %s1296_s1, 4  ;;  %p56_p13 = scmp.eq.s32.totalorder %s1055_s17, 0  ;;  %s170_s26 = int_to_ptr.hbm [resolvable:$true] %s169_s26 }
  0x15   : > { %842 = dma.hbm_to_vmem [thread:$0]  (!%p840_p10), %s170_s26, 1024, %s172_s29, [#allocation7], %s1290_s30, %s1290_s30, %s1059_s4  }
  0x16   : > { %s1307_s5 = smov (%p41_p11, %s39_s5), 0  ;;  %p1157_p0 = por %p56_p13, %p55_p12 }
  0x17   : > { %p1163_p3 = por %p1120_p2, %p55_p12  ;;  %s43_s9 = ssub.s32 %s1051_s16, %s1307_s5 }
  0x18   : > { %p852_p5 = scmp.lt.s32.totalorder %s1055_s17, 4  ;;  %p46_p7 = scmp.eq.s32.totalorder %s43_s9, 0 }
  0x19   : > { %s191_s10 = sand.u32 1, %s1043_s14   ;;  %s789_s19 = sshll.u32 %s1051_s16, 6 }
  0x1a   : > { %s713_s11 = sshll.u32 %s191_s10, 6  ;;  %s201_s26 = scalar_lea.hbm %s1286_s0, %s789_s19 }
  0x1b   : > { %s1172_s18 = scalar_select %p46_p7, %s1043_s14, %s48_s6  }
  0x1c   : > { %s195_s28 = scalar_lea.vmem [#allocation3], %s713_s11  ;;  %s202_s21 = sshll.u32 %s201_s26, 4  ;;  %s203_s21 = int_to_ptr.hbm [resolvable:$true] %s202_s21 }
  0x1d   : > { %s204_s29 = sshll.u32 %s195_s28, 4  ;;  %p844_p2 = pnand %p852_p5, %p1157_p0  ;;  %s205_s29 = int_to_ptr.vmem [resolvable:$true] %s204_s29 }
  0x1e   : > { %s192_s30 = scalar_lea.sflag [#allocation4], %s191_s10  ;;  %s1300_s1 = smov 64  }
  0x1f   : > { %846 = dma.hbm_to_vmem [thread:$0]  (!%p844_p2), %s203_s21, 1024, %s205_s29, %s192_s30, %s1300_s1, %s1300_s1, %s1059_s4  }
  0x20   : > { %216 = sbr.rel (%p1139_p8) target bundleno = 238 (0xee), region = 32  ;;  %s1186_s6 = sand.u32 (!%p1139_p8), 1, %s1039_s13  }
  0x21   : > { %s717_s9 = sshll.u32 (!%p1139_p8), %s1186_s6, 6  ;;  %s219_s11 = scalar_lea.sflag (!%p1139_p8), [#allocation4], %s1186_s6 }
  0x22   : > { %s1190_s19 = scalar_lea.vmem (!%p1139_p8), [#allocation3], %s717_s9 }
  0x25   : > { %1022 = dma.done.wait (%p1126_p4), %s219_s11, 1024  }
  0x26   : > { %1024 = vsyncadd (%p1126_p4), %s219_s11, 4294966272 }
  0x27   : > { %1026 = dma.done.wait (%p1116_p1), [#allocation7], 1024  }
  0x28   : > { %1028 = vsyncadd (%p1116_p1), [#allocation7], 4294966272  ;;  %v805_v0 = vld [vmem:[#allocation6 + $0x38] sm:$0xff]  ;;  %v804_v1 = vld [vmem:[#allocation6 + $0x30] sm:$0xff]  ;;  %s719_s22 = sshll.u32 %s1186_s6, 7  ;;  %s806_s30 = sshll.u32 %s1047_s15, 7 }
  0x29   : > { %424 = vmatpush.bf16.msra.mxu0 %v805_v0  ;;  %807 = vmatpush.bf16.msra.mxu1 %v805_v0  ;;  %v803_v2 = vld [vmem:[#allocation6 + $0x28] sm:$0xff]  ;;  %v802_v3 = vld [vmem:[#allocation6 + $0x20] sm:$0xff]  ;;  %v801_v4 = vld [vmem:[#allocation6 + $0x18] sm:$0xff]  ;;  %s1216_s27 = scalar_lea.vmem [#allocation8], %s719_s22  ;;  %s589_s10 = scalar_lea.hbm %s1289_s3, %s806_s30 }
  0x2a   : > { %808 = vmatpush.bf16.msra.mxu2 %v805_v0  ;;  %809 = vmatpush.bf16.msra.mxu3 %v805_v0  ;;  %v800_v5 = vld [vmem:[#allocation6 + $0x10] sm:$0xff]  ;;  %v799_v6 = vld [vmem:[#allocation6 + $0x8] sm:$0xff]  ;;  %v798_v7 = vld [vmem:[#allocation6] sm:$0xff]  ;;  %s590_s24 = sshll.u32 %s1216_s27, 4  ;;  %s592_s15 = sshll.u32 %s589_s10, 4  ;;  %s591_s24 = int_to_ptr.vmem [resolvable:$true] %s590_s24  ;;  %s593_s15 = int_to_ptr.hbm [resolvable:$true] %s592_s15 }
  0x2b   : > { %v790_v8 = vld [vmem:[%s1190_s19] sm:$0xff]  ;;  %v792_v9 = vld [vmem:[%s1190_s19 + $0x10] sm:$0xff]  ;;  %v791_v12 = vld [vmem:[%s1190_s19 + $0x8] sm:$0xff]  ;;  %s577_s25 = scalar_lea.sflag [#allocation5], %s1186_s6  ;;  %s983_s26 = sshra.s32 %s593_s15, 4  ;;  %s984_s26 = int_to_ptr.hbm [resolvable:$true] %s983_s26 }
  0x2c   : > { %v794_v10 = vld [vmem:[%s1190_s19 + $0x20] sm:$0xff]  ;;  %v796_v11 = vld [vmem:[%s1190_s19 + $0x30] sm:$0xff]  ;;  %v793_v13 = vld [vmem:[%s1190_s19 + $0x18] sm:$0xff]  ;;  %s985_s28 = scalar_lea.hbm %s984_s26, 128  ;;  %s989_s9 = scalar_lea.hbm %s1289_s3, 512 }
  0x2d   : > { %425 = vmatpush.bf16.msra.mxu0 %v804_v1  ;;  %810 = vmatpush.bf16.msra.mxu1 %v804_v1  ;;  %v795_v14 = vld [vmem:[%s1190_s19 + $0x28] sm:$0xff]  ;;  %v797_v15 = vld [vmem:[%s1190_s19 + $0x38] sm:$0xff]  ;;  %v1211_v16 = vld [vmem:[%s1288_s2] ss:$0 sm:$0xff]  ;;  %p986_p1 = scmp.ne.s32.totalorder %s984_s26, %s985_s28  ;;  %p990_p9 = scmp.lt.s32.totalorder %s984_s26, %s1289_s3 }
  0x2e   : > { %811 = vmatpush.bf16.msra.mxu2 %v804_v1  ;;  %812 = vmatpush.bf16.msra.mxu3 %v804_v1  ;;  %p991_p10 = scmp.lt.s32.totalorder %s989_s9, %s985_s28 }
  0x2f   : > { %p987_p4 = pnand %p986_p1, %p1163_p3 }
  0x30   : > { %p992_p11 = por %p991_p10, %p990_p9 }
  0x31   : > { %426 = vmatpush.bf16.msra.mxu0 %v803_v2  ;;  %813 = vmatpush.bf16.msra.mxu1 %v803_v2  ;;  %p988_p8 = pneg %p987_p4 }
  0x32   : > { %814 = vmatpush.bf16.msra.mxu2 %v803_v2  ;;  %815 = vmatpush.bf16.msra.mxu3 %v803_v2 }
  0x33   : > { %p993_p12 = pnand %p992_p11, %p988_p8 }
  0x35   : > { %427 = vmatpush.bf16.msra.mxu0 %v802_v3  ;;  %816 = vmatpush.bf16.msra.mxu1 %v802_v3 }
  0x36   : > { %817 = vmatpush.bf16.msra.mxu2 %v802_v3  ;;  %818 = vmatpush.bf16.msra.mxu3 %v802_v3 }
  0x39   : > { %428 = vmatpush.bf16.msra.mxu0 %v801_v4  ;;  %819 = vmatpush.bf16.msra.mxu1 %v801_v4 }
  0x3a   : > { %820 = vmatpush.bf16.msra.mxu2 %v801_v4  ;;  %821 = vmatpush.bf16.msra.mxu3 %v801_v4 }
  0x3d   : > { %429 = vmatpush.bf16.msra.mxu0 %v800_v5  ;;  %822 = vmatpush.bf16.msra.mxu1 %v800_v5 }
  0x3e   : > { %823 = vmatpush.bf16.msra.mxu2 %v800_v5  ;;  %824 = vmatpush.bf16.msra.mxu3 %v800_v5 }
  0x41   : > { %430 = vmatpush.bf16.msra.mxu0 %v799_v6  ;;  %825 = vmatpush.bf16.msra.mxu1 %v799_v6 }
  0x42   : > { %826 = vmatpush.bf16.msra.mxu2 %v799_v6  ;;  %827 = vmatpush.bf16.msra.mxu3 %v799_v6 }
  0x45   : > { %431 = vmatpush.bf16.msra.mxu0 %v798_v7  ;;  %828 = vmatpush.bf16.msra.mxu1 %v798_v7 }
  0x46   : > { %829 = vmatpush.bf16.msra.mxu2 %v798_v7  ;;  %830 = vmatpush.bf16.msra.mxu3 %v798_v7 }
  0x48   : > { %432 = vmatmul.bf16.vlgmr.msra.gmra.mxu0 %v790_v8  ;;  %442 = vmatmul.bf16.vlgmr.msra.gmra.mxu1 %v792_v9 }
  0x49   : > { %452 = vmatmul.bf16.vlgmr.msra.gmra.mxu2 %v794_v10  ;;  %462 = vmatmul.bf16.vlgmr.msra.gmra.mxu3 %v796_v11 }
  0x58   : > { %437 = vmatmul.bf16.gmra.mxu0 %v791_v12  ;;  %447 = vmatmul.bf16.gmra.mxu1 %v793_v13 }
  0x59   : > { %457 = vmatmul.bf16.gmra.mxu2 %v795_v14  ;;  %467 = vmatmul.bf16.gmra.mxu3 %v797_v15 }
  0xc5   : > { %v433_v17 = vpop.f32.mrf.mxu0  ;;  %v443_v18 = vpop.f32.mrf.mxu1 }
  0xc6   : > { %v528_v19 = vadd.f32 %v1211_v16, %v433_v17  ;;  %v532_v20 = vadd.f32 %v1211_v16, %v443_v18 }
  0xc8   : > { %v544_v21 = vmax.f32 %v528_v19, 0.0  ;;  %v548_v22 = vmax.f32 %v532_v20, 0.0 }
  0xca   : > { %560 = vst [vmem:[%s1216_s27] sm:$0xff] %v544_v21 }
  0xcb   : > { %564 = vst [vmem:[%s1216_s27 + $0x20] sm:$0xff] %v548_v22 }
  0xcc   : > { %v453_v23 = vpop.f32.mrf.mxu2  ;;  %v463_v24 = vpop.f32.mrf.mxu3 }
  0xcd   : > { %v536_v25 = vadd.f32 %v1211_v16, %v453_v23  ;;  %v540_v26 = vadd.f32 %v1211_v16, %v463_v24  ;;  %v435_v27 = vpop.f32.mrf.mxu0  ;;  %v445_v28 = vpop.f32.mrf.mxu1 }
  0xce   : > { %v529_v29 = vadd.f32 %v1211_v16, %v435_v27  ;;  %v533_v30 = vadd.f32 %v1211_v16, %v445_v28 }
  0xcf   : > { %v552_v31 = vmax.f32 %v536_v25, 0.0  ;;  %v556_v32 = vmax.f32 %v540_v26, 0.0 }
  0xd0   : > { %v545_v33 = vmax.f32 %v529_v29, 0.0  ;;  %v549_v34 = vmax.f32 %v533_v30, 0.0 }
  0xd1   : > { %568 = vst [vmem:[%s1216_s27 + $0x40] sm:$0xff] %v552_v31 }
  0xd2   : > { %572 = vst [vmem:[%s1216_s27 + $0x60] sm:$0xff] %v556_v32 }
  0xd3   : > { %561 = vst [vmem:[%s1216_s27 + $0x8] sm:$0xff] %v545_v33 }
  0xd4   : > { %565 = vst [vmem:[%s1216_s27 + $0x28] sm:$0xff] %v549_v34  ;;  %v455_v35 = vpop.f32.mrf.mxu2  ;;  %v465_v36 = vpop.f32.mrf.mxu3 }
  0xd5   : > { %v537_v37 = vadd.f32 %v1211_v16, %v455_v35  ;;  %v541_v38 = vadd.f32 %v1211_v16, %v465_v36  ;;  %v438_v39 = vpop.f32.mrf.mxu0  ;;  %v448_v40 = vpop.f32.mrf.mxu1 }
  0xd6   : > { %v530_v41 = vadd.f32 %v1211_v16, %v438_v39  ;;  %v534_v42 = vadd.f32 %v1211_v16, %v448_v40 }
  0xd7   : > { %v553_v43 = vmax.f32 %v537_v37, 0.0  ;;  %v557_v44 = vmax.f32 %v541_v38, 0.0 }
  0xd8   : > { %v546_v45 = vmax.f32 %v530_v41, 0.0  ;;  %v550_v46 = vmax.f32 %v534_v42, 0.0 }
  0xd9   : > { %569 = vst [vmem:[%s1216_s27 + $0x48] sm:$0xff] %v553_v43 }
  0xda   : > { %573 = vst [vmem:[%s1216_s27 + $0x68] sm:$0xff] %v557_v44 }
  0xdb   : > { %562 = vst [vmem:[%s1216_s27 + $0x10] sm:$0xff] %v546_v45 }
  0xdc   : > { %566 = vst [vmem:[%s1216_s27 + $0x30] sm:$0xff] %v550_v46  ;;  %v458_v47 = vpop.f32.mrf.mxu2  ;;  %v468_v48 = vpop.f32.mrf.mxu3 }
  0xdd   : > { %v538_v49 = vadd.f32 %v1211_v16, %v458_v47  ;;  %v542_v50 = vadd.f32 %v1211_v16, %v468_v48  ;;  %v440_v51 = vpop.f32.mrf.mxu0  ;;  %v450_v52 = vpop.f32.mrf.mxu1 }
  0xde   : > { %v531_v53 = vadd.f32 %v1211_v16, %v440_v51  ;;  %v535_v54 = vadd.f32 %v1211_v16, %v450_v52 }
  0xdf   : > { %v554_v55 = vmax.f32 %v538_v49, 0.0  ;;  %v558_v56 = vmax.f32 %v542_v50, 0.0 }
  0xe0   : > { %v547_v57 = vmax.f32 %v531_v53, 0.0  ;;  %v551_v58 = vmax.f32 %v535_v54, 0.0 }
  0xe1   : > { %570 = vst [vmem:[%s1216_s27 + $0x50] sm:$0xff] %v554_v55 }
  0xe2   : > { %574 = vst [vmem:[%s1216_s27 + $0x70] sm:$0xff] %v558_v56 }
  0xe3   : > { %563 = vst [vmem:[%s1216_s27 + $0x18] sm:$0xff] %v547_v57 }
  0xe4   : > { %567 = vst [vmem:[%s1216_s27 + $0x38] sm:$0xff] %v551_v58  ;;  %v460_v59 = vpop.f32.mrf.mxu2  ;;  %v470_v60 = vpop.f32.mrf.mxu3 }
  0xe5   : > { %v539_v61 = vadd.f32 %v1211_v16, %v460_v59  ;;  %v543_v62 = vadd.f32 %v1211_v16, %v470_v60 }
  0xe7   : > { %v555_v63 = vmax.f32 %v539_v61, 0.0  ;;  %v559_v0 = vmax.f32 %v543_v62, 0.0 }
  0xe9   : > { %571 = vst [vmem:[%s1216_s27 + $0x58] sm:$0xff] %v555_v63 }
  0xea   : > { %575 = vst [vmem:[%s1216_s27 + $0x78] sm:$0xff] %v559_v0 }
  0xeb   : > { %996 = shalt.err (!%p993_p12)
}
  0xec   : > { %s1060_s6 = smov 128   ;;  %s1061_s1 = smov 8  }
  0xed   : > { %837 = dma.vmem_to_hbm [thread:$0]  (%p1163_p3), %s591_s24, 2048, %s593_s15, %s577_s25, %s1060_s6, %s1060_s6, %s1061_s1  }
  0xee PF: > { %p854_p13 = scmp.ge.s32.totalorder %s1055_s17, 2  ;;  %s607_s20 = sand.u32 1, %s1035_s12  }
  0xef   : > { %s608_s22 = scalar_lea.sflag [#allocation5], %s607_s20 }
  0xf0   : > { %p848_p0 = pnand %p854_p13, %p1131_p6 }
  0xf2   : > { %p849_p5 = pneg %p848_p0 }
  0xf4   : > { %1030 = dma.done.wait (%p849_p5), %s608_s22, 2048  }
  0xf5   : > { %1032 = vsyncadd (%p849_p5), %s608_s22, 4294965248  ;;  %s20_s17 = sadd.s32 1, %s1055_s17   ;;  %s1301_s12 = smov %s1039_s13 }
  0xf6   : > { %p17_p7 = scmp.ge.s32.totalorder %s20_s17, 6   ;;  %s1302_s13 = smov %s1043_s14 }
  0xf7   : > { %s1303_s14 = smov %s1172_s18  ;;  %s1304_s15 = smov %s1051_s16 }
  0xf8   : > { %s1305_s16 = smov %s1307_s5  ;;  %19 = sbr.rel (!%p17_p7) target bundleno = 9 (0x9), region = 93 }
  0xfd   :  { %614 = vsyncpa [#allocation4], 1 }
  0xfe   :  { %616 = vsyncpa [#allocation4 + $0x1], 1 }
  0xff   :  { %617 = vsyncpa [#allocation7], 1 }
 0x100   :  { %618 = vsyncpa [#allocation5], 1 }
 0x101   :  { %620 = vsyncpa [#allocation5 + $0x1], 1 }

</bundles_post_ra>
